<compile_context>
chip_gen: v5e
topology: v5e:2x2
jax: 0.10.0
libtpu: 0.0.40
codegen_flags: <defaults>
</compile_context>

<pallas_src>
import functools

import jax
import jax.numpy as jnp
from jax import lax
from jax.experimental import pallas as pl
from jax.experimental.pallas import tpu as pltpu


def _round_up(x, m):
    return ((x + m - 1) // m) * m


# ---------------------------------------------------------------------------
# Phase 1: batched input projection  x_proj = x @ W_ih + b
#   (M = T*Bp rows -> real MXU utilization; off the serial recurrence path.)
# ---------------------------------------------------------------------------
def _xproj_kernel(x_ref, w_ref, b_ref, o_ref):
    o_ref[...] = (jnp.dot(x_ref[...], w_ref[...],
                          preferred_element_type=jnp.float32)
                  + b_ref[...])


def _input_projection(x2d_bf16, w_ih_bf16, b_f32):
    M, Dp = x2d_bf16.shape
    four_hp = w_ih_bf16.shape[1]
    tm = min(M, 256)                       # multiple of 8 (M is Bp-multiple)
    Mp = _round_up(M, tm)
    if Mp != M:
        x2d_bf16 = jnp.zeros((Mp, Dp), x2d_bf16.dtype).at[:M].set(x2d_bf16)

    out = pl.pallas_call(
        _xproj_kernel,
        out_shape=jax.ShapeDtypeStruct((Mp, four_hp), jnp.float32),
        grid_spec=pltpu.PrefetchScalarGridSpec(
            num_scalar_prefetch=0,
            grid=(Mp // tm,),
            in_specs=[
                pl.BlockSpec((tm, Dp), lambda i: (i, 0)),
                pl.BlockSpec((Dp, four_hp), lambda i: (0, 0)),   # resident
                pl.BlockSpec((1, four_hp), lambda i: (0, 0)),    # resident
            ],
            out_specs=pl.BlockSpec((tm, four_hp), lambda i: (i, 0)),
        ),
        compiler_params=pltpu.CompilerParams(
            dimension_semantics=("parallel",)),
        cost_estimate=pl.CostEstimate(
            flops=2 * Mp * Dp * four_hp,
            transcendentals=0,
            bytes_accessed=Mp * Dp * 2 + Dp * four_hp * 2 + Mp * four_hp * 4),
    )(x2d_bf16, w_ih_bf16, b_f32)
    return out[:M]


# ---------------------------------------------------------------------------
# Phase 2: serial LSTM recurrence.  grid=(n_chunks,), Tc local steps fused
# inside each grid step via an unrolled fori_loop; h/c carried in vregs.
#   Gate order along the 4*Hp axis: [i, f, o, g] (blocked per Hp lanes).
# ---------------------------------------------------------------------------
def _lstm_recurrence_kernel(xp_ref, h0_ref, c0_ref, whh_ref,
                            h_out_ref, c_out_ref, h_scr, c_scr,
                            *, seq_len, chunk):
    ci = pl.program_id(0)

    # Load the initial hidden state into the VMEM-resident carry on chunk 0.
    @pl.when(ci == 0)
    def _():
        h_scr[...] = h0_ref[...]
        c_scr[...] = c0_ref[...]

    hp = h_out_ref.shape[-1]
    w_hh = whh_ref[...]                      # (Hp, 4*Hp) bf16, VMEM-resident
    base = ci * chunk
    needs_mask = (seq_len % chunk) != 0      # only mask a ragged tail chunk

    def step(t, carry):
        h, c = carry
        xp = xp_ref[t]                       # (Bp, 4*Hp) f32  (x@W_ih + b)
        gates = jnp.dot(h.astype(jnp.bfloat16), w_hh,
                        preferred_element_type=jnp.float32) + xp
        # [i, f, o] sigmoids in one contiguous 3*Hp-lane EUP op; tanh(g) apart.
        sig = jax.nn.sigmoid(gates[:, :3 * hp])
        i_g = sig[:, 0 * hp:1 * hp]
        f_g = sig[:, 1 * hp:2 * hp]
        o_g = sig[:, 2 * hp:3 * hp]
        g_g = jnp.tanh(gates[:, 3 * hp:4 * hp])
        c_new = f_g * c + i_g * g_g
        h_new = o_g * jnp.tanh(c_new)
        if needs_mask:
            valid = (base + t) < seq_len
            h_new = jnp.where(valid, h_new, h)
            c_new = jnp.where(valid, c_new, c)
        return h_new, c_new

    h, c = lax.fori_loop(0, chunk, step, (h_scr[...], c_scr[...]), unroll=True)
    h_scr[...] = h
    c_scr[...] = c

    # Lane-dense (Hp multiple of 128) full-tile stores, HBM writeback once.
    @pl.when(ci == pl.num_programs(0) - 1)
    def _():
        h_out_ref[...] = h
        c_out_ref[...] = c


# ---------------------------------------------------------------------------
# Wrappers
# ---------------------------------------------------------------------------
def lstm_sequence(x_seq, h0, c0, params, *, chunk=8):
    """Apply the LSTMCell incrementally over x_seq: (T, B, D) -> final (h, c)."""
    T, B, D = x_seq.shape
    H, Dp, Hp = params["H"], params["Dp"], params["Hp"]
    Bp = _round_up(max(B, 8), 8)
    chunk = min(chunk, T)
    n_chunks = pl.cdiv(T, chunk)
    Tp = n_chunks * chunk

    # Pad + cast x once (bf16 halves DMA); zero-padding keeps padded lanes 0.
    x_p = jnp.zeros((Tp, Bp, Dp), jnp.bfloat16).at[:T, :B, :D].set(
        x_seq.astype(jnp.bfloat16))

    # Phase 1: batched projection off the serial path.
    x_proj = _input_projection(
        x_p.reshape(Tp * Bp, Dp), params["w_ih_p"], params["b_p"],
    ).reshape(Tp, Bp, 4 * Hp)

    h_p = jnp.zeros((Bp, Hp), jnp.float32).at[:B, :H].set(h0.astype(jnp.float32))
    c_p = jnp.zeros((Bp, Hp), jnp.float32).at[:B, :H].set(c0.astype(jnp.float32))

    kernel = functools.partial(_lstm_recurrence_kernel, seq_len=T, chunk=chunk)

    grid_spec = pltpu.PrefetchScalarGridSpec(
        num_scalar_prefetch=0,
        grid=(n_chunks,),
        in_specs=[
            pl.BlockSpec((chunk, Bp, 4 * Hp), lambda ci: (ci, 0, 0)),  # x_proj chunk
            pl.BlockSpec((Bp, Hp), lambda ci: (0, 0)),                 # h0
            pl.BlockSpec((Bp, Hp), lambda ci: (0, 0)),                 # c0
            pl.BlockSpec((Hp, 4 * Hp), lambda ci: (0, 0)),             # W_hh resident
        ],
        out_specs=(
            pl.BlockSpec((Bp, Hp), lambda ci: (0, 0)),                 # final h
            pl.BlockSpec((Bp, Hp), lambda ci: (0, 0)),                 # final c
        ),
        scratch_shapes=[
            pltpu.VMEM((Bp, Hp), jnp.float32),                         # h carry
            pltpu.VMEM((Bp, Hp), jnp.float32),                         # c carry
        ],
    )

    cost = pl.CostEstimate(
        flops=2 * Tp * Bp * Hp * (4 * Hp),
        transcendentals=5 * Tp * Bp * Hp,
        bytes_accessed=(Tp * Bp * 4 * Hp * 4      # x_proj
                        + Hp * 4 * Hp * 2         # bf16 W_hh
                        + 2 * Bp * Hp * 4         # h0, c0
                        + 2 * Bp * Hp * 4),       # outputs
    )

    h_f, c_f = pl.pallas_call(
        kernel,
        out_shape=(
            jax.ShapeDtypeStruct((Bp, Hp), jnp.float32),
            jax.ShapeDtypeStruct((Bp, Hp), jnp.float32),
        ),
        grid_spec=grid_spec,
        compiler_params=pltpu.CompilerParams(
            dimension_semantics=("arbitrary",)),   # sequential recurrence axis
        cost_estimate=cost,
    )(x_proj, h_p, c_p, params["w_hh_p"])

    return h_f[:B, :H], c_f[:B, :H]


def incremental_recurrence_chaplot_forward(input_vector, hidden_vectors, params,
                                           output_emb_dim):
    """Mirrors IncrementalRecurrenceChaplotModule.forward (one LSTMCell step)."""
    B = input_vector.shape[0]
    H = output_emb_dim
    if hidden_vectors is None:
        # TODO(synk): PyTorch uses empty (uninitialized) (1, H) tensors here;
        # zeros of matching batch are used instead (deliberate deviation).
        h0 = jnp.zeros((B, H), jnp.float32)
        c0 = jnp.zeros((B, H), jnp.float32)
    else:
        h0, c0 = hidden_vectors
    return lstm_sequence(input_vector[None].astype(jnp.float32), h0, c0, params)


# ---------------------------------------------------------------------------
# Parameters
# ---------------------------------------------------------------------------
def init_params(key, input_emb_dim, output_emb_dim):
    """PyTorch-LSTMCell-style init (uniform(-1/sqrt(H), 1/sqrt(H))), biases
    zeroed as in init_weights().  Weights are packed gate-blocked + padded in
    kernel gate order [i, f, o, g] and stored bf16 (f32 accumulation)."""
    D, H = input_emb_dim, output_emb_dim
    Dp, Hp = _round_up(D, 128), _round_up(H, 128)
    k1, k2 = jax.random.split(key)
    bound = 1.0 / float(jnp.sqrt(jnp.float32(H)))
    # Transposed layouts (in_features, 4H), PyTorch gate order [i, f, g, o].
    w_ih = jax.random.uniform(k1, (D, 4 * H), jnp.float32, -bound, bound)
    w_hh = jax.random.uniform(k2, (H, 4 * H), jnp.float32, -bound, bound)
    bias = jnp.zeros((1, 4 * H), jnp.float32)   # b_ih + b_hh, both zeroed

    # Kernel gate slots [i, f, o, g] <- PyTorch gate indices [0, 1, 3, 2];
    # gate slot k occupies lane-aligned columns [k*Hp : k*Hp+H].
    w_ih_p = jnp.zeros((Dp, 4 * Hp), jnp.float32)
    w_hh_p = jnp.zeros((Hp, 4 * Hp), jnp.float32)
    b_p = jnp.zeros((1, 4 * Hp), jnp.float32)
    for slot, g in enumerate((0, 1, 3, 2)):
        w_ih_p = w_ih_p.at[:D, slot * Hp:slot * Hp + H].set(
            w_ih[:, g * H:(g + 1) * H])
        w_hh_p = w_hh_p.at[:H, slot * Hp:slot * Hp + H].set(
            w_hh[:, g * H:(g + 1) * H])
        b_p = b_p.at[:, slot * Hp:slot * Hp + H].set(bias[:, g * H:(g + 1) * H])

    return {
        "w_ih_p": w_ih_p.astype(jnp.bfloat16),   # (Dp, 4*Hp) bf16
        "w_hh_p": w_hh_p.astype(jnp.bfloat16),   # (Hp, 4*Hp) bf16
        "b_p": b_p,                              # (1, 4*Hp)  f32
        "w_ih": w_ih, "w_hh": w_hh, "bias": bias,  # unpacked f32 (reference)
        "D": D, "H": H, "Dp": Dp, "Hp": Hp,
    }


# ---------------------------------------------------------------------------
# Pure-JAX reference (mirrors the kernel's bf16-MXU / f32-accumulate numerics;
# bf16 weights deviate from a pure-f32 PyTorch LSTMCell at ~1e-3 level).
# ---------------------------------------------------------------------------
def _reference_step(x, h, c, params):
    H = params["H"]
    bf = jnp.bfloat16
    gates = (jnp.dot(x.astype(bf), params["w_ih"].astype(bf),
                     preferred_element_type=jnp.float32)
             + jnp.dot(h.astype(bf), params["w_hh"].astype(bf),
                       preferred_element_type=jnp.float32)
             + params["bias"])
    i = jax.nn.sigmoid(gates[:, 0 * H:1 * H])
    f = jax.nn.sigmoid(gates[:, 1 * H:2 * H])
    g = jnp.tanh(gates[:, 2 * H:3 * H])
    o = jax.nn.sigmoid(gates[:, 3 * H:4 * H])
    c_new = f * c + i * g
    h_new = o * jnp.tanh(c_new)
    return h_new, c_new


if __name__ == "__main__":
    B, input_emb_dim, output_emb_dim, T = 2, 32, 32, 8

    key = jax.random.PRNGKey(0)
    k_p, k_x, k_h, k_c = jax.random.split(key, 4)

    params = init_params(k_p, input_emb_dim, output_emb_dim)
    x_seq = jax.random.normal(k_x, (T, B, input_emb_dim), jnp.float32)
    h0 = jax.random.normal(k_h, (B, output_emb_dim), jnp.float32)
    c0 = jax.random.normal(k_c, (B, output_emb_dim), jnp.float32)

    # Case 1: single module forward step with explicit hidden state.
    h1, c1 = incremental_recurrence_chaplot_forward(
        x_seq[0], (h0, c0), params, output_emb_dim)
    jax.block_until_ready((h1, c1))
    h1_ref, c1_ref = _reference_step(x_seq[0], h0, c0, params)
    assert jnp.allclose(h1, h1_ref, atol=1e-3, rtol=1e-3)
    assert jnp.allclose(c1, c1_ref, atol=1e-3, rtol=1e-3)

    # Case 2: hidden_vectors is None -> zero-initialized state.
    h1n, c1n = incremental_recurrence_chaplot_forward(
        x_seq[0], None, params, output_emb_dim)
    jax.block_until_ready((h1n, c1n))
    h1n_ref, c1n_ref = _reference_step(
        x_seq[0], jnp.zeros_like(h0), jnp.zeros_like(c0), params)
    assert jnp.allclose(h1n, h1n_ref, atol=1e-3, rtol=1e-3)
    assert jnp.allclose(c1n, c1n_ref, atol=1e-3, rtol=1e-3)

    # Case 3: fused incremental recurrence over T steps (in-kernel time loop).
    hT, cT = lstm_sequence(x_seq, h0, c0, params)
    jax.block_until_ready((hT, cT))
    h_r, c_r = h0, c0
    for t in range(T):
        h_r, c_r = _reference_step(x_seq[t], h_r, c_r, params)
    assert jnp.allclose(hT, h_r, atol=2e-3, rtol=2e-3)
    assert jnp.allclose(cT, c_r, atol=2e-3, rtol=2e-3)

    # Case 4: T not divisible by the chunk size (ragged tail masking path).
    h5, c5 = lstm_sequence(x_seq[:5], h0, c0, params, chunk=4)
    jax.block_until_ready((h5, c5))
    h_r, c_r = h0, c0
    for t in range(5):
        h_r, c_r = _reference_step(x_seq[t], h_r, c_r, params)
    assert jnp.allclose(h5, h_r, atol=2e-3, rtol=2e-3)
    assert jnp.allclose(c5, c_r, atol=2e-3, rtol=2e-3)

    print("KERNEL_OK")
</pallas_src>

<mosaic_0001>
module attributes {stable_mosaic.version = 11 : i64} {
  func.func @_xproj_kernel(%arg0: i32, %arg1: memref<8x128xbf16, #tpu.memory_space<vmem>>, %arg2: memref<128x512xbf16, #tpu.memory_space<vmem>>, %arg3: memref<1x512xf32, #tpu.memory_space<vmem>>, %arg4: memref<8x512xf32, #tpu.memory_space<vmem>>) attributes {dimension_semantics = [#tpu.dimension_semantics<parallel>], iteration_bounds = array<i64: 1>, scalar_prefetch = 0 : i64, scratch_operands = 0 : i64, tpu.core_type = #tpu.core_type<tc>, window_params = [{transform_indices = @transform_0, window_bounds = array<i64: 8, 128>}, {pipeline_mode = #tpu.pipeline_mode<synchronous>, transform_indices = @transform_1, window_bounds = array<i64: 128, 512>}, {pipeline_mode = #tpu.pipeline_mode<synchronous>, transform_indices = @transform_2, window_bounds = array<i64: 1, 512>}, {transform_indices = @transform_3, window_bounds = array<i64: 8, 512>}]} {
    %c0 = arith.constant 0 : index
    %c0_0 = arith.constant 0 : index
    %0 = vector.load %arg1[%c0, %c0_0] : memref<8x128xbf16, #tpu.memory_space<vmem>>, vector<8x128xbf16>
    %c0_1 = arith.constant 0 : index
    %c0_2 = arith.constant 0 : index
    %1 = vector.load %arg2[%c0_1, %c0_2] : memref<128x512xbf16, #tpu.memory_space<vmem>>, vector<128x512xbf16>
    %cst = arith.constant dense<0.000000e+00> : vector<8x512xf32>
    %2 = tpu.matmul %0, %1, %cst {dimension_numbers = #tpu.dot_dimension_numbers<[1], [0], [0], [1], [0, 0, 1, 1], [], []>} : vector<8x128xbf16>, vector<128x512xbf16>, vector<8x512xf32> -> vector<8x512xf32>
    %c0_3 = arith.constant 0 : index
    %c0_4 = arith.constant 0 : index
    %3 = vector.load %arg3[%c0_3, %c0_4] : memref<1x512xf32, #tpu.memory_space<vmem>>, vector<1x512xf32>
    %4 = vector.broadcast %3 : vector<1x512xf32> to vector<8x512xf32>
    %5 = arith.addf %2, %4 : vector<8x512xf32>
    %c0_5 = arith.constant 0 : index
    %c0_6 = arith.constant 0 : index
    %6 = vector.load %arg4[%c0_5, %c0_6] : memref<8x512xf32, #tpu.memory_space<vmem>>, vector<8x512xf32>
    tpu.vector_store %arg4[%c0_5, %c0_6], %5 {strides = array<i32>} : memref<8x512xf32, #tpu.memory_space<vmem>>, vector<8x512xf32>,
    return
  }
  func.func @transform_0(%arg0: i32) -> (i32, i32) {
    %c0_i32 = arith.constant 0 : i32
    %c0_i32_0 = arith.constant 0 : i32
    return %arg0, %c0_i32 : i32, i32
  }
  func.func @transform_1(%arg0: i32) -> (i32, i32) {
    %c0_i32 = arith.constant 0 : i32
    %c0_i32_0 = arith.constant 0 : i32
    %c0_i32_1 = arith.constant 0 : i32
    return %c0_i32, %c0_i32_0 : i32, i32
  }
  func.func @transform_2(%arg0: i32) -> (i32, i32) {
    %c0_i32 = arith.constant 0 : i32
    %c0_i32_0 = arith.constant 0 : i32
    %c0_i32_1 = arith.constant 0 : i32
    return %c0_i32, %c0_i32_0 : i32, i32
  }
  func.func @transform_3(%arg0: i32) -> (i32, i32) {
    %c0_i32 = arith.constant 0 : i32
    %c0_i32_0 = arith.constant 0 : i32
    return %arg0, %c0_i32 : i32, i32
  }
}

</mosaic_0001>

<bundles_post_ra>
// kernel: tpu_custom_call.1
= control target key start
LH: loop header
LB: loop body
LE: loop exit
PB: predicated region body
PF: predicated region fallthrough
CT: control target
= control target key end

     0   :  { %8 = vsyncpa [#allocation3], 0  ;;  %s641_s0 = inlined_call_operand.hbm [shape: bf16[8,128], index: 0, kind: input, shape index: {}]   ;;  %s642_s1 = inlined_call_operand.hbm [shape: bf16[128,512], index: 1, kind: input, shape index: {}]   ;;  %s643_s2 = inlined_call_operand.hbm [shape: f32[1,512], index: 2, kind: input, shape index: {}]   ;;  %s644_s3 = inlined_call_operand.hbm [shape: f32[8,512], index: 3, kind: output, shape index: {}]  }
   0x1   :  { %9 = vsyncpa [#allocation6], 0  ;;  %s26_s14 = sshll.u32 %s642_s1, 4  ;;  %s27_s14 = int_to_ptr.hbm [resolvable:$true] %s26_s14 }
   0x2   :  { %10 = vsyncpa [#allocation4], 0  ;;  %s603_s15 = smov [#allocation5]   ;;  %s16_s19 = sshll.u32 %s641_s0, 4  ;;  %s17_s19 = int_to_ptr.hbm [resolvable:$true] %s16_s19 }
   0x3   :  { %s28_s16 = sshll.u32 %s603_s15, 4  ;;  %s604_s20 = smov 256   ;;  %s29_s16 = int_to_ptr.vmem [resolvable:$true] %s28_s16 }
   0x4   :  { %s605_s21 = smov 16   ;;  %s606_s22 = smov [#allocation2]  }
   0x5   :  { %34 = dma.hbm_to_vmem [thread:$0]  %s27_s14, 4096, %s29_s16, [#allocation6], %s604_s20, %s604_s20, %s605_s21  }
   0x6   :  { %s18_s23 = sshll.u32 %s606_s22, 4  ;;  %s40_s26 = sshll.u32 %s643_s2, 4  ;;  %s19_s23 = int_to_ptr.vmem [resolvable:$true] %s18_s23  ;;  %s41_s26 = int_to_ptr.hbm [resolvable:$true] %s40_s26 }
   0x7   :  { %21 = dma.hbm_to_vmem [thread:$0]  %s17_s19, 64, %s19_s23, [#allocation3]  }
   0x8   :  { %s607_s1 = smov [#allocation7]  }
   0x9   :  { %s42_s27 = sshll.u32 %s607_s1, 4  ;;  %s43_s27 = int_to_ptr.vmem [resolvable:$true] %s42_s27 }
   0xa   :  { %45 = dma.hbm_to_vmem [thread:$0]  %s41_s26, 64, %s43_s27, [#allocation6]  }
   0xb   :  { %597 = dma.done.wait [#allocation3], 64  }
   0xc   :  { %598 = vsyncadd [#allocation3], 4294967232 }
   0xd   :  { %599 = dma.done.wait [#allocation6], 4160  }
   0xe   :  { %600 = vsyncadd [#allocation6], 4294963136  ;;  %v449_v0 = vld [vmem:[#allocation5 + $0xe0] sm:$0xf]  ;;  %v493_v1 = vld [vmem:[#allocation5 + $0xec] sm:$0xf0] }
   0xf   :  { %v491_v2 = vld [vmem:[#allocation5 + $0xe4] sm:$0xf]  ;;  %v450_v3 = vor.u32 %v493_v1, %v449_v0  ;;  %v451_v4 = vld [vmem:[#allocation5 + $0xf0] sm:$0xf0]  ;;  %v457_v5 = vld [vmem:[#allocation5 + $0xe8] sm:$0xf] }
  0x10   :  { %v494_v6 = vld [vmem:[#allocation5 + $0xf4] sm:$0xf0]  ;;  %v454_v7 = vor.u32 %v491_v2, %v451_v4  ;;  %v492_v9 = vld [vmem:[#allocation5 + $0xec] sm:$0xf]  ;;  %v459_v10 = vld [vmem:[#allocation5 + $0xf8] sm:$0xf0] }
  0x11   :  { %v458_v8 = vor.u32 %v494_v6, %v457_v5  ;;  %v433_v11 = vld [vmem:[#allocation5 + $0xc0] sm:$0xf]  ;;  %261 = vmatpush.bf16.msra.mxu0 %v450_v3  ;;  %v462_v12 = vor.u32 %v492_v9, %v459_v10  ;;  %v489_v13 = vld [vmem:[#allocation5 + $0xcc] sm:$0xf0]  ;;  %v487_v14 = vld [vmem:[#allocation5 + $0xc4] sm:$0xf] }
  0x12   :  { %v435_v15 = vld [vmem:[#allocation5 + $0xd0] sm:$0xf0]  ;;  %274 = vmatpush.bf16.msra.mxu1 %v454_v7  ;;  %v434_v16 = vor.u32 %v489_v13, %v433_v11  ;;  %v441_v18 = vld [vmem:[#allocation5 + $0xc8] sm:$0xf]  ;;  %v490_v19 = vld [vmem:[#allocation5 + $0xd4] sm:$0xf0] }
  0x13   :  { %287 = vmatpush.bf16.msra.mxu2 %v458_v8  ;;  %v438_v17 = vor.u32 %v487_v14, %v435_v15  ;;  %v488_v20 = vld [vmem:[#allocation5 + $0xcc] sm:$0xf]  ;;  %300 = vmatpush.bf16.msra.mxu3 %v462_v12  ;;  %v442_v21 = vor.u32 %v490_v19, %v441_v18  ;;  %v443_v22 = vld [vmem:[#allocation5 + $0xd8] sm:$0xf0]  ;;  %v417_v23 = vld [vmem:[#allocation5 + $0xa0] sm:$0xf] }
  0x14   :  { %v485_v24 = vld [vmem:[#allocation5 + $0xac] sm:$0xf0]  ;;  %v446_v25 = vor.u32 %v488_v20, %v443_v22  ;;  %v483_v26 = vld [vmem:[#allocation5 + $0xa4] sm:$0xf]  ;;  %v419_v27 = vld [vmem:[#allocation5 + $0xb0] sm:$0xf0] }
  0x15   :  { %v425_v28 = vld [vmem:[#allocation5 + $0xa8] sm:$0xf]  ;;  %262 = vmatpush.bf16.msra.mxu0 %v434_v16  ;;  %v418_v29 = vor.u32 %v485_v24, %v417_v23  ;;  %v486_v30 = vld [vmem:[#allocation5 + $0xb4] sm:$0xf0]  ;;  %v484_v31 = vld [vmem:[#allocation5 + $0xac] sm:$0xf]  ;;  %v422_v33 = vor.u32 %v483_v26, %v419_v27 }
  0x16   :  { %v427_v32 = vld [vmem:[#allocation5 + $0xb8] sm:$0xf0]  ;;  %275 = vmatpush.bf16.msra.mxu1 %v438_v17  ;;  %v426_v34 = vor.u32 %v486_v30, %v425_v28  ;;  %v401_v35 = vld [vmem:[#allocation5 + $0x80] sm:$0xf]  ;;  %v481_v36 = vld [vmem:[#allocation5 + $0x8c] sm:$0xf0] }
  0x17   :  { %288 = vmatpush.bf16.msra.mxu2 %v442_v21  ;;  %v479_v37 = vld [vmem:[#allocation5 + $0x84] sm:$0xf]  ;;  %301 = vmatpush.bf16.msra.mxu3 %v446_v25  ;;  %v430_v38 = vor.u32 %v484_v31, %v427_v32  ;;  %v403_v39 = vld [vmem:[#allocation5 + $0x90] sm:$0xf0]  ;;  %v409_v40 = vld [vmem:[#allocation5 + $0x88] sm:$0xf]  ;;  %v402_v44 = vor.u32 %v481_v36, %v401_v35 }
  0x18   :  { %v482_v41 = vld [vmem:[#allocation5 + $0x94] sm:$0xf0]  ;;  %v480_v42 = vld [vmem:[#allocation5 + $0x8c] sm:$0xf]  ;;  %v411_v43 = vld [vmem:[#allocation5 + $0x98] sm:$0xf0]  ;;  %v406_v45 = vor.u32 %v479_v37, %v403_v39 }
  0x19   :  { %263 = vmatpush.bf16.msra.mxu0 %v418_v29  ;;  %v410_v46 = vor.u32 %v482_v41, %v409_v40  ;;  %v385_v47 = vld [vmem:[#allocation5 + $0x60] sm:$0xf]  ;;  %v477_v48 = vld [vmem:[#allocation5 + $0x6c] sm:$0xf0]  ;;  %v475_v49 = vld [vmem:[#allocation5 + $0x64] sm:$0xf]  ;;  %v414_v50 = vor.u32 %v480_v42, %v411_v43 }
  0x1a   :  { %276 = vmatpush.bf16.msra.mxu1 %v422_v33  ;;  %v387_v51 = vld [vmem:[#allocation5 + $0x70] sm:$0xf0]  ;;  %v393_v52 = vld [vmem:[#allocation5 + $0x68] sm:$0xf]  ;;  %v478_v53 = vld [vmem:[#allocation5 + $0x74] sm:$0xf0]  ;;  %v386_v56 = vor.u32 %v477_v48, %v385_v47 }
  0x1b   :  { %289 = vmatpush.bf16.msra.mxu2 %v426_v34  ;;  %302 = vmatpush.bf16.msra.mxu3 %v430_v38  ;;  %v476_v54 = vld [vmem:[#allocation5 + $0x6c] sm:$0xf]  ;;  %v395_v55 = vld [vmem:[#allocation5 + $0x78] sm:$0xf0]  ;;  %v390_v57 = vor.u32 %v475_v49, %v387_v51  ;;  %v394_v58 = vor.u32 %v478_v53, %v393_v52  ;;  %v369_v59 = vld [vmem:[#allocation5 + $0x40] sm:$0xf] }
  0x1c   :  { %v473_v60 = vld [vmem:[#allocation5 + $0x4c] sm:$0xf0]  ;;  %v471_v61 = vld [vmem:[#allocation5 + $0x44] sm:$0xf]  ;;  %v398_v62 = vor.u32 %v476_v54, %v395_v55  ;;  %v371_v63 = vld [vmem:[#allocation5 + $0x50] sm:$0xf0] }
  0x1d   :  { %264 = vmatpush.bf16.msra.mxu0 %v402_v44  ;;  %v377_v0 = vld [vmem:[#allocation5 + $0x48] sm:$0xf]  ;;  %v474_v1 = vld [vmem:[#allocation5 + $0x54] sm:$0xf0]  ;;  %v472_v2 = vld [vmem:[#allocation5 + $0x4c] sm:$0xf]  ;;  %v370_v4 = vor.u32 %v473_v60, %v369_v59  ;;  %v374_v5 = vor.u32 %v471_v61, %v371_v63 }
  0x1e   :  { %277 = vmatpush.bf16.msra.mxu1 %v406_v45  ;;  %v379_v3 = vld [vmem:[#allocation5 + $0x58] sm:$0xf0]  ;;  %v378_v6 = vor.u32 %v474_v1, %v377_v0  ;;  %v353_v7 = vld [vmem:[#allocation5 + $0x20] sm:$0xf]  ;;  %v469_v8 = vld [vmem:[#allocation5 + $0x2c] sm:$0xf0] }
  0x1f   :  { %290 = vmatpush.bf16.msra.mxu2 %v410_v46  ;;  %303 = vmatpush.bf16.msra.mxu3 %v414_v50  ;;  %v467_v9 = vld [vmem:[#allocation5 + $0x24] sm:$0xf]  ;;  %v382_v10 = vor.u32 %v472_v2, %v379_v3  ;;  %v355_v11 = vld [vmem:[#allocation5 + $0x30] sm:$0xf0]  ;;  %v361_v12 = vld [vmem:[#allocation5 + $0x28] sm:$0xf]  ;;  %v354_v16 = vor.u32 %v469_v8, %v353_v7 }
  0x20   :  { %v470_v13 = vld [vmem:[#allocation5 + $0x34] sm:$0xf0]  ;;  %v468_v14 = vld [vmem:[#allocation5 + $0x2c] sm:$0xf]  ;;  %v363_v15 = vld [vmem:[#allocation5 + $0x38] sm:$0xf0]  ;;  %v358_v17 = vor.u32 %v467_v9, %v355_v11 }
  0x21   :  { %265 = vmatpush.bf16.msra.mxu0 %v386_v56  ;;  %v362_v18 = vor.u32 %v470_v13, %v361_v12  ;;  %v337_v19 = vld [vmem:[#allocation5] sm:$0xf]  ;;  %v465_v20 = vld [vmem:[#allocation5 + $0xc] sm:$0xf0]  ;;  %v463_v21 = vld [vmem:[#allocation5 + $0x4] sm:$0xf]  ;;  %v366_v22 = vor.u32 %v468_v14, %v363_v15 }
  0x22   :  { %278 = vmatpush.bf16.msra.mxu1 %v390_v57  ;;  %v339_v23 = vld [vmem:[#allocation5 + $0x10] sm:$0xf0]  ;;  %v345_v24 = vld [vmem:[#allocation5 + $0x8] sm:$0xf]  ;;  %v466_v25 = vld [vmem:[#allocation5 + $0x14] sm:$0xf0]  ;;  %v338_v28 = vor.u32 %v465_v20, %v337_v19 }
  0x23   :  { %291 = vmatpush.bf16.msra.mxu2 %v394_v58  ;;  %304 = vmatpush.bf16.msra.mxu3 %v398_v62  ;;  %v464_v26 = vld [vmem:[#allocation5 + $0xc] sm:$0xf]  ;;  %v347_v27 = vld [vmem:[#allocation5 + $0x18] sm:$0xf0]  ;;  %v342_v29 = vor.u32 %v463_v21, %v339_v23  ;;  %v346_v30 = vor.u32 %v466_v25, %v345_v24  ;;  %v91_v33 = vld [vmem:[#allocation7] sm:$0xf] }
  0x24   :  { %v350_v31 = vor.u32 %v464_v26, %v347_v27  ;;  %v58_v32 = vld [vmem:[#allocation2] sm:$0xf]  ;;  %v93_v34 = vperm.slane %v91_v33, 0  ;;  %v94_v35 = vperm.slane %v91_v33, 1  ;;  %v95_v40 = vperm.slane %v91_v33, 2  ;;  %s608_s0 = smov [#allocation8]  }
  0x25   :  { %266 = vmatpush.bf16.msra.mxu0 %v370_v4  ;;  %v96_v41 = vperm.slane %v91_v33, 3  ;;  %s322_s2 = sshll.u32 %s608_s0, 4  ;;  %s324_s30 = sshll.u32 %s644_s3, 4  ;;  %s323_s2 = int_to_ptr.vmem [resolvable:$true] %s322_s2  ;;  %s325_s30 = int_to_ptr.hbm [resolvable:$true] %s324_s30 }
  0x26   :  { %279 = vmatpush.bf16.msra.mxu1 %v374_v5 }
  0x27   :  { %292 = vmatpush.bf16.msra.mxu2 %v378_v6  ;;  %305 = vmatpush.bf16.msra.mxu3 %v382_v10 }
  0x29   :  { %267 = vmatpush.bf16.msra.mxu0 %v354_v16 }
  0x2a   :  { %280 = vmatpush.bf16.msra.mxu1 %v358_v17 }
  0x2b   :  { %293 = vmatpush.bf16.msra.mxu2 %v362_v18  ;;  %306 = vmatpush.bf16.msra.mxu3 %v366_v22 }
  0x2d   :  { %268 = vmatpush.bf16.msra.mxu0 %v338_v28 }
  0x2e   :  { %281 = vmatpush.bf16.msra.mxu1 %v342_v29 }
  0x2f   :  { %294 = vmatpush.bf16.msra.mxu2 %v346_v30  ;;  %307 = vmatpush.bf16.msra.mxu3 %v350_v31 }
  0x30   :  { %269 = vmatmul.bf16.vlgmr.msra.gmra.mxu0 %v58_v32 }
  0x31   :  { %282 = vmatmul.bf16.vlgmr.msra.gmra.mxu1 %v58_v32 }
  0x32   :  { %295 = vmatmul.bf16.vlgmr.msra.gmra.mxu2 %v58_v32  ;;  %308 = vmatmul.bf16.vlgmr.msra.gmra.mxu3 %v58_v32 }
  0xad   :  { %v270_v36 = vpop.f32.mrf.mxu0 }
  0xae   :  { %v271_v37 = vadd.f32 %v270_v36, %v93_v34  ;;  %v283_v38 = vpop.f32.mrf.mxu1 }
  0xaf   :  { %v284_v39 = vadd.f32 %v283_v38, %v94_v35 }
  0xb0   :  { %313 = vst [vmem:[#allocation8] sm:$0xff] %v271_v37 }
  0xb1   :  { %314 = vst [vmem:[#allocation8 + $0x8] sm:$0xff] %v284_v39 }
  0xb5   :  { %v296_v42 = vpop.f32.mrf.mxu2  ;;  %v309_v44 = vpop.f32.mrf.mxu3 }
  0xb6   :  { %v297_v43 = vadd.f32 %v296_v42, %v95_v40  ;;  %v272_v45 = vpop.f32.mrf.mxu0  ;;  %v310_v46 = vadd.f32 %v309_v44, %v96_v41  ;;  %v285_v47 = vpop.f32.mrf.mxu1 }
  0xb8   :  { %315 = vst [vmem:[#allocation8 + $0x10] sm:$0xff] %v297_v43 }
  0xb9   :  { %316 = vst [vmem:[#allocation8 + $0x18] sm:$0xff] %v310_v46 }
  0xba   :  { %327 = dma.vmem_to_hbm [thread:$0]  %s323_s2, 512, %s325_s30, [#allocation4]  }
  0xbd   :  { %v298_v48 = vpop.f32.mrf.mxu2  ;;  %v311_v49 = vpop.f32.mrf.mxu3 }
  0xbe   :  { %601 = dma.done.wait [#allocation4], 512  }
  0xbf   :  { %602 = vsyncadd [#allocation4], 4294966784 }
  0xc0   :  { %332 = vsyncpa [#allocation3], 1 }
  0xc1   :  { %333 = vsyncpa [#allocation6], 1 }
  0xc2   :  { %334 = vsyncpa [#allocation4], 1 }

</bundles_post_ra>
